<compile_context>
chip_gen: v6e
topology: v6e:2x2x1
jax: 0.10.0
libtpu: 0.0.40
codegen_flags: <defaults>
</compile_context>

<pallas_src>
import functools

import jax
import jax.numpy as jnp
from jax.experimental import pallas as pl
from jax.experimental.pallas import tpu as pltpu


def _round_up(n, m):
    return ((n + m - 1) // m) * m


def _pad2(a, rows, cols):
    r, c = a.shape
    return jnp.pad(a, ((0, rows - r), (0, cols - c)))


def _nbytes(*arrs):
    return int(sum(a.size * a.dtype.itemsize for a in arrs))


# --------------------------- encoder kernel ----------------------------------
def _encoder_kernel(xc_ref, w1_ref, b1_ref, w2_ref, b2_ref, w3e_ref, b3e_ref,
                    enc_ref):
    f32 = jnp.float32
    cdt = w1_ref.dtype
    relu = lambda v: jnp.maximum(v, 0.0)
    h1 = relu(jnp.dot(xc_ref[...], w1_ref[...], preferred_element_type=f32)
              + b1_ref[...])
    h2 = relu(jnp.dot(h1.astype(cdt), w2_ref[...], preferred_element_type=f32)
              + b2_ref[...])
    enc_ref[...] = (jnp.dot(h2.astype(cdt), w3e_ref[...],
                            preferred_element_type=f32) + b3e_ref[...])


# --------------------------- decoder kernel ----------------------------------
def _decoder_kernel(Lp, Fp,
                    enc_ref, c_ref, eps_ref,
                    w3z_ref, w3c_ref, b3_ref, w4_ref, b4_ref, w5_ref, b5_ref,
                    z_ref, recon_ref, logvarx_ref):
    f32 = jnp.float32
    cdt = w3z_ref.dtype
    relu = lambda v: jnp.maximum(v, 0.0)

    enc = enc_ref[...]                            # [T, 2*Lp] f32, mu || logvar
    mu = enc[:, :Lp]                              # aligned 128-lane split
    std = jnp.exp(0.5 * enc[:, Lp:])
    z = mu + std * eps_ref[...]                   # [T, Lp] f32
    z_ref[...] = z

    # fc3(cat[z, c]) as split-weight sum, fc4, fused fc51 || fc52
    h3 = relu(jnp.dot(z.astype(cdt), w3z_ref[...], preferred_element_type=f32)
              + jnp.dot(c_ref[...], w3c_ref[...], preferred_element_type=f32)
              + b3_ref[...])
    h4 = relu(jnp.dot(h3.astype(cdt), w4_ref[...], preferred_element_type=f32)
              + b4_ref[...])
    x5 = (jnp.dot(h4.astype(cdt), w5_ref[...], preferred_element_type=f32)
          + b5_ref[...])                          # [T, 2*Fp] = x_mu || logvar_x

    # lane-tile-aligned split stores; sigmoid only on the x_mu half (no wasted EUP)
    recon_ref[...] = jax.nn.sigmoid(x5[:, :Fp])
    logvarx_ref[...] = x5[:, Fp:]


# ------------------------------- wrapper --------------------------------------
def iwae_forward(x, c, eps, params, *, compute_dtype=jnp.bfloat16, row_tile=256):
    """Pallas implementation of ImageGaussianIWAE.forward(x, c, k)."""
    f32 = jnp.float32
    cd = compute_dtype

    B, F = x.shape
    _, C = c.shape
    _, K, L = eps.shape
    H = params["w2"].shape[0]
    BK = B * K

    # ---- padded (lane-dense) dimensions ------------------------------------
    Lp = _round_up(L, 128)
    Fp = _round_up(F, 128)
    Cp = _round_up(C, 128)
    Hp = _round_up(H, 128)
    FCp = _round_up(F + C, 128)

    # ---- row tiling (multiple of 8 sublanes; >=256 rows at production sizes)
    TB = row_tile if B >= row_tile else _round_up(B, 8)
    Bp = _round_up(B, TB)
    T = row_tile if BK >= row_tile else _round_up(BK, 8)
    BKp = _round_up(BK, T)

    # ---- pad / fuse / cast parameters (layout plumbing only) ----------------
    # NOTE: at production scale, pre-pad & cast these once outside the step.
    w1 = _pad2(params["w1"], FCp, Hp).astype(cd)
    b1 = _pad2(params["b1"].reshape(1, -1), 1, Hp)
    w2 = _pad2(params["w2"], Hp, Hp).astype(cd)
    b2 = _pad2(params["b2"].reshape(1, -1), 1, Hp)
    w3e = jnp.zeros((Hp, 2 * Lp), f32)
    w3e = w3e.at[:H, :L].set(params["w31"]).at[:H, Lp:Lp + L].set(params["w32"])
    w3e = w3e.astype(cd)
    b3e = jnp.zeros((1, 2 * Lp), f32)
    b3e = b3e.at[0, :L].set(params["b31"]).at[0, Lp:Lp + L].set(params["b32"])

    w3z = _pad2(params["w3z"], Lp, Hp).astype(cd)
    w3c = _pad2(params["w3c"], Cp, Hp).astype(cd)
    b3 = _pad2(params["b3"].reshape(1, -1), 1, Hp)
    w4 = _pad2(params["w4"], Hp, Hp).astype(cd)
    b4 = _pad2(params["b4"].reshape(1, -1), 1, Hp)
    w5 = jnp.zeros((Hp, 2 * Fp), f32)
    w5 = w5.at[:H, :F].set(params["w51"]).at[:H, Fp:Fp + F].set(params["w52"])
    w5 = w5.astype(cd)
    b5 = jnp.zeros((1, 2 * Fp), f32)
    b5 = b5.at[0, :F].set(params["b51"]).at[0, Fp:Fp + F].set(params["b52"])

    # ---- encoder inputs ------------------------------------------------------
    xc = _pad2(jnp.concatenate([x, c], axis=1), Bp, FCp).astype(cd)

    enc_w_bytes = _nbytes(w1, b1, w2, b2, w3e, b3e)
    enc_tile_bytes = TB * FCp * xc.dtype.itemsize + TB * 2 * Lp * 4
    enc_vmem = int(min(max(enc_w_bytes + 4 * enc_tile_bytes + (4 << 20),
                           32 << 20), 64 << 20))
    enc_cost = pl.CostEstimate(
        flops=2 * Bp * (FCp * Hp + Hp * Hp + Hp * 2 * Lp),
        transcendentals=0,
        bytes_accessed=_nbytes(xc, w1, b1, w2, b2, w3e, b3e) + Bp * 2 * Lp * 4)

    enc = pl.pallas_call(
        _encoder_kernel,
        out_shape=jax.ShapeDtypeStruct((Bp, 2 * Lp), f32),
        grid=(Bp // TB,),
        in_specs=[
            pl.BlockSpec((TB, FCp), lambda i: (i, 0)),
            pl.BlockSpec((FCp, Hp), lambda i: (0, 0)),
            pl.BlockSpec((1, Hp), lambda i: (0, 0)),
            pl.BlockSpec((Hp, Hp), lambda i: (0, 0)),
            pl.BlockSpec((1, Hp), lambda i: (0, 0)),
            pl.BlockSpec((Hp, 2 * Lp), lambda i: (0, 0)),
            pl.BlockSpec((1, 2 * Lp), lambda i: (0, 0)),
        ],
        out_specs=pl.BlockSpec((TB, 2 * Lp), lambda i: (i, 0)),
        compiler_params=pltpu.CompilerParams(
            dimension_semantics=("parallel",),
            vmem_limit_bytes=enc_vmem),
        cost_estimate=enc_cost,
    )(xc, w1, b1, w2, b2, w3e, b3e)

    mu_z = enc[:B, :L]
    logvar_z = enc[:B, Lp:Lp + L]

    # ---- decoder inputs: repeat per-batch stats/conditioning over K ---------
    enc_rep = jnp.pad(jnp.repeat(enc[:B], K, axis=0), ((0, BKp - BK), (0, 0)))
    c_rep = _pad2(jnp.repeat(c, K, axis=0), BKp, Cp).astype(cd)
    eps_flat = _pad2(eps.reshape(BK, L), BKp, Lp)

    dec_w_bytes = _nbytes(w3z, w3c, b3, w4, b4, w5, b5)
    dec_tile_bytes = (T * 2 * Lp * 4 + T * Cp * c_rep.dtype.itemsize
                      + T * Lp * 4 + T * Lp * 4 + 2 * T * Fp * 4)
    dec_vmem = int(min(max(dec_w_bytes + 4 * dec_tile_bytes + (4 << 20),
                           32 << 20), 64 << 20))
    dec_cost = pl.CostEstimate(
        flops=2 * BKp * (Lp * Hp + Cp * Hp + Hp * Hp + Hp * 2 * Fp),
        transcendentals=BKp * (Lp + Fp),
        bytes_accessed=(_nbytes(enc_rep, c_rep, eps_flat,
                                w3z, w3c, b3, w4, b4, w5, b5)
                        + BKp * (Lp + 2 * Fp) * 4))

    z_pad, recon_pad, logvarx_pad = pl.pallas_call(
        functools.partial(_decoder_kernel, Lp, Fp),
        out_shape=(
            jax.ShapeDtypeStruct((BKp, Lp), f32),
            jax.ShapeDtypeStruct((BKp, Fp), f32),
            jax.ShapeDtypeStruct((BKp, Fp), f32),
        ),
        grid=(BKp // T,),
        in_specs=[
            pl.BlockSpec((T, 2 * Lp), lambda i: (i, 0)),
            pl.BlockSpec((T, Cp), lambda i: (i, 0)),
            pl.BlockSpec((T, Lp), lambda i: (i, 0)),
            pl.BlockSpec((Lp, Hp), lambda i: (0, 0)),
            pl.BlockSpec((Cp, Hp), lambda i: (0, 0)),
            pl.BlockSpec((1, Hp), lambda i: (0, 0)),
            pl.BlockSpec((Hp, Hp), lambda i: (0, 0)),
            pl.BlockSpec((1, Hp), lambda i: (0, 0)),
            pl.BlockSpec((Hp, 2 * Fp), lambda i: (0, 0)),
            pl.BlockSpec((1, 2 * Fp), lambda i: (0, 0)),
        ],
        out_specs=(
            pl.BlockSpec((T, Lp), lambda i: (i, 0)),
            pl.BlockSpec((T, Fp), lambda i: (i, 0)),
            pl.BlockSpec((T, Fp), lambda i: (i, 0)),
        ),
        compiler_params=pltpu.CompilerParams(
            dimension_semantics=("parallel",),
            vmem_limit_bytes=dec_vmem),
        cost_estimate=dec_cost,
    )(enc_rep, c_rep, eps_flat, w3z, w3c, b3, w4, b4, w5, b5)

    z = z_pad[:BK, :L].reshape(B, K, L)
    recon_x = recon_pad[:BK, :F].reshape(B, K, F)
    logvar_x = logvarx_pad[:BK, :F].reshape(B, K, F)
    # q_z_g_x = Normal(mu_z, exp(0.5*logvar_z)) is reconstructed by the caller.
    return recon_x, logvar_x, mu_z, logvar_z, z


# ------------------------- parameter init (deterministic) --------------------
def init_params(key, F, C, L, H):
    """torch.nn.Linear-style U(-1/sqrt(fan_in), 1/sqrt(fan_in)), stored [in,out]."""
    def lin(k, fan_in, shape):
        bound = 1.0 / float(fan_in) ** 0.5
        return jax.random.uniform(k, shape, jnp.float32, -bound, bound)

    ks = jax.random.split(key, 17)
    p = {}
    # encoder
    p["w1"], p["b1"] = lin(ks[0], F + C, (F + C, H)), lin(ks[1], F + C, (H,))
    p["w2"], p["b2"] = lin(ks[2], H, (H, H)), lin(ks[3], H, (H,))
    p["w31"], p["b31"] = lin(ks[4], H, (H, L)), lin(ks[5], H, (L,))
    p["w32"], p["b32"] = lin(ks[6], H, (H, L)), lin(ks[7], H, (L,))
    # decoder (fc3 input = cat[z, c] -> split weights)
    p["w3z"] = lin(ks[8], L + C, (L, H))
    p["w3c"] = lin(ks[9], L + C, (C, H))
    p["b3"] = lin(ks[10], L + C, (H,))
    p["w4"], p["b4"] = lin(ks[11], H, (H, H)), lin(ks[12], H, (H,))
    p["w51"], p["b51"] = lin(ks[13], H, (H, F)), lin(ks[14], H, (F,))
    p["w52"], p["b52"] = lin(ks[15], H, (H, F)), lin(ks[16], H, (F,))
    return p


# ------------------------- pure-JAX reference (mirrors the torch module) -----
def reference_forward(x, c, eps, p):
    relu = lambda v: jnp.maximum(v, 0.0)
    inputs = jnp.concatenate([x, c], axis=1)
    h1 = relu(inputs @ p["w1"] + p["b1"])
    h2 = relu(h1 @ p["w2"] + p["b2"])
    mu_z = h2 @ p["w31"] + p["b31"]
    logvar_z = h2 @ p["w32"] + p["b32"]
    std = jnp.exp(0.5 * logvar_z)
    z = mu_z[:, None, :] + std[:, None, :] * eps                       # [B,K,L]
    h3 = relu(jnp.einsum("bkl,lh->bkh", z, p["w3z"])
              + (c @ p["w3c"])[:, None, :] + p["b3"])
    h4 = relu(jnp.einsum("bkh,hg->bkg", h3, p["w4"]) + p["b4"])
    x_mu = jnp.einsum("bkh,hf->bkf", h4, p["w51"]) + p["b51"]
    recon_x = jax.nn.sigmoid(x_mu)
    logvar_x = jnp.einsum("bkh,hf->bkf", h4, p["w52"]) + p["b52"]
    return recon_x, logvar_x, mu_z, logvar_z, z


if __name__ == "__main__":
    # small shapes consistent with the module's forward
    B, F, C, L, H, K = 2, 16, 4, 8, 32, 8   # batch, feature, class, latent, hidden, k

    key = jax.random.PRNGKey(0)
    kx, kc, keps, kp = jax.random.split(key, 4)
    x = jax.random.uniform(kx, (B, F), jnp.float32)          # "image" features in [0,1)
    c = jax.random.uniform(kc, (B, C), jnp.float32)          # conditioning vector
    eps = jax.random.normal(keps, (B, K, L), jnp.float32)    # reparameterization noise
    params = init_params(kp, F, C, L, H)

    refs = reference_forward(x, c, eps, params)
    names = ["recon_x", "logvar_x", "mu_z", "logvar_z", "z"]

    # exactness check: f32 matmul path
    fwd_f32 = jax.jit(functools.partial(iwae_forward, compute_dtype=jnp.float32))
    outs = jax.block_until_ready(fwd_f32(x, c, eps, params))
    for name, got, want in zip(names, outs, refs):
        assert got.shape == want.shape, (name, got.shape, want.shape)
        assert jnp.allclose(got, want, atol=1e-4, rtol=1e-4), ("f32", name)

    # performance path: bf16 matmul operands, f32 MXU accumulation
    fwd_bf16 = jax.jit(functools.partial(iwae_forward, compute_dtype=jnp.bfloat16))
    outs = jax.block_until_ready(fwd_bf16(x, c, eps, params))
    for name, got, want in zip(names, outs, refs):
        assert got.shape == want.shape, (name, got.shape, want.shape)
        assert jnp.allclose(got, want, atol=5e-2, rtol=5e-2), ("bf16", name)

    print("KERNEL_OK")
</pallas_src>

<mosaic_0001>
module attributes {stable_mosaic.version = 11 : i64} {
  func.func @_encoder_kernel(%arg0: i32, %arg1: memref<8x128xf32, #tpu.memory_space<vmem>>, %arg2: memref<128x128xf32, #tpu.memory_space<vmem>>, %arg3: memref<1x128xf32, #tpu.memory_space<vmem>>, %arg4: memref<128x128xf32, #tpu.memory_space<vmem>>, %arg5: memref<1x128xf32, #tpu.memory_space<vmem>>, %arg6: memref<128x256xf32, #tpu.memory_space<vmem>>, %arg7: memref<1x256xf32, #tpu.memory_space<vmem>>, %arg8: memref<8x256xf32, #tpu.memory_space<vmem>>) attributes {dimension_semantics = [#tpu.dimension_semantics<parallel>], iteration_bounds = array<i64: 1>, scalar_prefetch = 0 : i64, scratch_operands = 0 : i64, tpu.core_type = #tpu.core_type<tc>, window_params = [{transform_indices = @transform_0, window_bounds = array<i64: 8, 128>}, {pipeline_mode = #tpu.pipeline_mode<synchronous>, transform_indices = @transform_1, window_bounds = array<i64: 128, 128>}, {pipeline_mode = #tpu.pipeline_mode<synchronous>, transform_indices = @transform_2, window_bounds = array<i64: 1, 128>}, {pipeline_mode = #tpu.pipeline_mode<synchronous>, transform_indices = @transform_3, window_bounds = array<i64: 128, 128>}, {pipeline_mode = #tpu.pipeline_mode<synchronous>, transform_indices = @transform_4, window_bounds = array<i64: 1, 128>}, {pipeline_mode = #tpu.pipeline_mode<synchronous>, transform_indices = @transform_5, window_bounds = array<i64: 128, 256>}, {pipeline_mode = #tpu.pipeline_mode<synchronous>, transform_indices = @transform_6, window_bounds = array<i64: 1, 256>}, {transform_indices = @transform_7, window_bounds = array<i64: 8, 256>}]} {
    %c0 = arith.constant 0 : index
    %c0_0 = arith.constant 0 : index
    %0 = vector.load %arg1[%c0, %c0_0] : memref<8x128xf32, #tpu.memory_space<vmem>>, vector<8x128xf32>
    %c0_1 = arith.constant 0 : index
    %c0_2 = arith.constant 0 : index
    %1 = vector.load %arg2[%c0_1, %c0_2] : memref<128x128xf32, #tpu.memory_space<vmem>>, vector<128x128xf32>
    %cst = arith.constant dense<0.000000e+00> : vector<8x128xf32>
    %2 = tpu.matmul %0, %1, %cst {dimension_numbers = #tpu.dot_dimension_numbers<[1], [0], [0], [1], [0, 0, 1, 1], [], []>} : vector<8x128xf32>, vector<128x128xf32>, vector<8x128xf32> -> vector<8x128xf32>
    %c0_3 = arith.constant 0 : index
    %c0_4 = arith.constant 0 : index
    %3 = vector.load %arg3[%c0_3, %c0_4] : memref<1x128xf32, #tpu.memory_space<vmem>>, vector<1x128xf32>
    %4 = vector.broadcast %3 : vector<1x128xf32> to vector<8x128xf32>
    %5 = arith.addf %2, %4 : vector<8x128xf32>
    %cst_5 = arith.constant 0.000000e+00 : f32
    %6 = vector.broadcast %cst_5 : f32 to vector<8x128xf32>
    %7 = arith.maximumf %5, %6 : vector<8x128xf32>
    %c0_6 = arith.constant 0 : index
    %c0_7 = arith.constant 0 : index
    %8 = vector.load %arg4[%c0_6, %c0_7] : memref<128x128xf32, #tpu.memory_space<vmem>>, vector<128x128xf32>
    %cst_8 = arith.constant dense<0.000000e+00> : vector<8x128xf32>
    %9 = tpu.matmul %7, %8, %cst_8 {dimension_numbers = #tpu.dot_dimension_numbers<[1], [0], [0], [1], [0, 0, 1, 1], [], []>} : vector<8x128xf32>, vector<128x128xf32>, vector<8x128xf32> -> vector<8x128xf32>
    %c0_9 = arith.constant 0 : index
    %c0_10 = arith.constant 0 : index
    %10 = vector.load %arg5[%c0_9, %c0_10] : memref<1x128xf32, #tpu.memory_space<vmem>>, vector<1x128xf32>
    %11 = vector.broadcast %10 : vector<1x128xf32> to vector<8x128xf32>
    %12 = arith.addf %9, %11 : vector<8x128xf32>
    %cst_11 = arith.constant 0.000000e+00 : f32
    %13 = vector.broadcast %cst_11 : f32 to vector<8x128xf32>
    %14 = arith.maximumf %12, %13 : vector<8x128xf32>
    %c0_12 = arith.constant 0 : index
    %c0_13 = arith.constant 0 : index
    %15 = vector.load %arg6[%c0_12, %c0_13] : memref<128x256xf32, #tpu.memory_space<vmem>>, vector<128x256xf32>
    %cst_14 = arith.constant dense<0.000000e+00> : vector<8x256xf32>
    %16 = tpu.matmul %14, %15, %cst_14 {dimension_numbers = #tpu.dot_dimension_numbers<[1], [0], [0], [1], [0, 0, 1, 1], [], []>} : vector<8x128xf32>, vector<128x256xf32>, vector<8x256xf32> -> vector<8x256xf32>
    %c0_15 = arith.constant 0 : index
    %c0_16 = arith.constant 0 : index
    %17 = vector.load %arg7[%c0_15, %c0_16] : memref<1x256xf32, #tpu.memory_space<vmem>>, vector<1x256xf32>
    %18 = vector.broadcast %17 : vector<1x256xf32> to vector<8x256xf32>
    %19 = arith.addf %16, %18 : vector<8x256xf32>
    %c0_17 = arith.constant 0 : index
    %c0_18 = arith.constant 0 : index
    %20 = vector.load %arg8[%c0_17, %c0_18] : memref<8x256xf32, #tpu.memory_space<vmem>>, vector<8x256xf32>
    tpu.vector_store %arg8[%c0_17, %c0_18], %19 {strides = array<i32>} : memref<8x256xf32, #tpu.memory_space<vmem>>, vector<8x256xf32>,
    return
  }
  func.func @transform_0(%arg0: i32) -> (i32, i32) {
    %c0_i32 = arith.constant 0 : i32
    %c0_i32_0 = arith.constant 0 : i32
    return %arg0, %c0_i32 : i32, i32
  }
  func.func @transform_1(%arg0: i32) -> (i32, i32) {
    %c0_i32 = arith.constant 0 : i32
    %c0_i32_0 = arith.constant 0 : i32
    %c0_i32_1 = arith.constant 0 : i32
    return %c0_i32, %c0_i32_0 : i32, i32
  }
  func.func @transform_2(%arg0: i32) -> (i32, i32) {
    %c0_i32 = arith.constant 0 : i32
    %c0_i32_0 = arith.constant 0 : i32
    %c0_i32_1 = arith.constant 0 : i32
    return %c0_i32, %c0_i32_0 : i32, i32
  }
  func.func @transform_3(%arg0: i32) -> (i32, i32) {
    %c0_i32 = arith.constant 0 : i32
    %c0_i32_0 = arith.constant 0 : i32
    %c0_i32_1 = arith.constant 0 : i32
    return %c0_i32, %c0_i32_0 : i32, i32
  }
  func.func @transform_4(%arg0: i32) -> (i32, i32) {
    %c0_i32 = arith.constant 0 : i32
    %c0_i32_0 = arith.constant 0 : i32
    %c0_i32_1 = arith.constant 0 : i32
    return %c0_i32, %c0_i32_0 : i32, i32
  }
  func.func @transform_5(%arg0: i32) -> (i32, i32) {
    %c0_i32 = arith.constant 0 : i32
    %c0_i32_0 = arith.constant 0 : i32
    %c0_i32_1 = arith.constant 0 : i32
    return %c0_i32, %c0_i32_0 : i32, i32
  }
  func.func @transform_6(%arg0: i32) -> (i32, i32) {
    %c0_i32 = arith.constant 0 : i32
    %c0_i32_0 = arith.constant 0 : i32
    %c0_i32_1 = arith.constant 0 : i32
    return %c0_i32, %c0_i32_0 : i32, i32
  }
  func.func @transform_7(%arg0: i32) -> (i32, i32) {
    %c0_i32 = arith.constant 0 : i32
    %c0_i32_0 = arith.constant 0 : i32
    return %arg0, %c0_i32 : i32, i32
  }
}

module attributes {stable_mosaic.version = 11 : i64} {
  func.func @_decoder_kernel(%arg0: i32, %arg1: memref<16x256xf32, #tpu.memory_space<vmem>>, %arg2: memref<16x128xf32, #tpu.memory_space<vmem>>, %arg3: memref<16x128xf32, #tpu.memory_space<vmem>>, %arg4: memref<128x128xf32, #tpu.memory_space<vmem>>, %arg5: memref<128x128xf32, #tpu.memory_space<vmem>>, %arg6: memref<1x128xf32, #tpu.memory_space<vmem>>, %arg7: memref<128x128xf32, #tpu.memory_space<vmem>>, %arg8: memref<1x128xf32, #tpu.memory_space<vmem>>, %arg9: memref<128x256xf32, #tpu.memory_space<vmem>>, %arg10: memref<1x256xf32, #tpu.memory_space<vmem>>, %arg11: memref<16x128xf32, #tpu.memory_space<vmem>>, %arg12: memref<16x128xf32, #tpu.memory_space<vmem>>, %arg13: memref<16x128xf32, #tpu.memory_space<vmem>>) attributes {dimension_semantics = [#tpu.dimension_semantics<parallel>], iteration_bounds = array<i64: 1>, scalar_prefetch = 0 : i64, scratch_operands = 0 : i64, tpu.core_type = #tpu.core_type<tc>, window_params = [{transform_indices = @transform_0, window_bounds = array<i64: 16, 256>}, {transform_indices = @transform_1, window_bounds = array<i64: 16, 128>}, {transform_indices = @transform_2, window_bounds = array<i64: 16, 128>}, {pipeline_mode = #tpu.pipeline_mode<synchronous>, transform_indices = @transform_3, window_bounds = array<i64: 128, 128>}, {pipeline_mode = #tpu.pipeline_mode<synchronous>, transform_indices = @transform_4, window_bounds = array<i64: 128, 128>}, {pipeline_mode = #tpu.pipeline_mode<synchronous>, transform_indices = @transform_5, window_bounds = array<i64: 1, 128>}, {pipeline_mode = #tpu.pipeline_mode<synchronous>, transform_indices = @transform_6, window_bounds = array<i64: 128, 128>}, {pipeline_mode = #tpu.pipeline_mode<synchronous>, transform_indices = @transform_7, window_bounds = array<i64: 1, 128>}, {pipeline_mode = #tpu.pipeline_mode<synchronous>, transform_indices = @transform_8, window_bounds = array<i64: 128, 256>}, {pipeline_mode = #tpu.pipeline_mode<synchronous>, transform_indices = @transform_9, window_bounds = array<i64: 1, 256>}, {transform_indices = @transform_10, window_bounds = array<i64: 16, 128>}, {transform_indices = @transform_11, window_bounds = array<i64: 16, 128>}, {transform_indices = @transform_12, window_bounds = array<i64: 16, 128>}]} {
    %c0 = arith.constant 0 : index
    %c0_0 = arith.constant 0 : index
    %0 = vector.load %arg1[%c0, %c0_0] : memref<16x256xf32, #tpu.memory_space<vmem>>, vector<16x256xf32>
    %1 = vector.extract_strided_slice %0 {offsets = [0, 0], sizes = [16, 128], strides = [1, 1]} : vector<16x256xf32> to vector<16x128xf32>
    %2 = vector.extract_strided_slice %0 {offsets = [0, 128], sizes = [16, 128], strides = [1, 1]} : vector<16x256xf32> to vector<16x128xf32>
    %cst = arith.constant 5.000000e-01 : f32
    %3 = vector.broadcast %cst : f32 to vector<16x128xf32>
    %4 = arith.mulf %3, %2 : vector<16x128xf32>
    %5 = math.exp %4 : vector<16x128xf32>
    %c0_1 = arith.constant 0 : index
    %c0_2 = arith.constant 0 : index
    %6 = vector.load %arg3[%c0_1, %c0_2] : memref<16x128xf32, #tpu.memory_space<vmem>>, vector<16x128xf32>
    %7 = arith.mulf %5, %6 : vector<16x128xf32>
    %8 = arith.addf %1, %7 : vector<16x128xf32>
    %c0_3 = arith.constant 0 : index
    %c0_4 = arith.constant 0 : index
    %9 = vector.load %arg11[%c0_3, %c0_4] : memref<16x128xf32, #tpu.memory_space<vmem>>, vector<16x128xf32>
    tpu.vector_store %arg11[%c0_3, %c0_4], %8 {strides = array<i32>} : memref<16x128xf32, #tpu.memory_space<vmem>>, vector<16x128xf32>,
    %c0_5 = arith.constant 0 : index
    %c0_6 = arith.constant 0 : index
    %10 = vector.load %arg4[%c0_5, %c0_6] : memref<128x128xf32, #tpu.memory_space<vmem>>, vector<128x128xf32>
    %cst_7 = arith.constant dense<0.000000e+00> : vector<16x128xf32>
    %11 = tpu.matmul %8, %10, %cst_7 {dimension_numbers = #tpu.dot_dimension_numbers<[1], [0], [0], [1], [0, 0, 1, 1], [], []>} : vector<16x128xf32>, vector<128x128xf32>, vector<16x128xf32> -> vector<16x128xf32>
    %c0_8 = arith.constant 0 : index
    %c0_9 = arith.constant 0 : index
    %12 = vector.load %arg2[%c0_8, %c0_9] : memref<16x128xf32, #tpu.memory_space<vmem>>, vector<16x128xf32>
    %c0_10 = arith.constant 0 : index
    %c0_11 = arith.constant 0 : index
    %13 = vector.load %arg5[%c0_10, %c0_11] : memref<128x128xf32, #tpu.memory_space<vmem>>, vector<128x128xf32>
    %cst_12 = arith.constant dense<0.000000e+00> : vector<16x128xf32>
    %14 = tpu.matmul %12, %13, %cst_12 {dimension_numbers = #tpu.dot_dimension_numbers<[1], [0], [0], [1], [0, 0, 1, 1], [], []>} : vector<16x128xf32>, vector<128x128xf32>, vector<16x128xf32> -> vector<16x128xf32>
    %15 = arith.addf %11, %14 : vector<16x128xf32>
    %c0_13 = arith.constant 0 : index
    %c0_14 = arith.constant 0 : index
    %16 = vector.load %arg6[%c0_13, %c0_14] : memref<1x128xf32, #tpu.memory_space<vmem>>, vector<1x128xf32>
    %17 = vector.broadcast %16 : vector<1x128xf32> to vector<16x128xf32>
    %18 = arith.addf %15, %17 : vector<16x128xf32>
    %cst_15 = arith.constant 0.000000e+00 : f32
    %19 = vector.broadcast %cst_15 : f32 to vector<16x128xf32>
    %20 = arith.maximumf %18, %19 : vector<16x128xf32>
    %c0_16 = arith.constant 0 : index
    %c0_17 = arith.constant 0 : index
    %21 = vector.load %arg7[%c0_16, %c0_17] : memref<128x128xf32, #tpu.memory_space<vmem>>, vector<128x128xf32>
    %cst_18 = arith.constant dense<0.000000e+00> : vector<16x128xf32>
    %22 = tpu.matmul %20, %21, %cst_18 {dimension_numbers = #tpu.dot_dimension_numbers<[1], [0], [0], [1], [0, 0, 1, 1], [], []>} : vector<16x128xf32>, vector<128x128xf32>, vector<16x128xf32> -> vector<16x128xf32>
    %c0_19 = arith.constant 0 : index
    %c0_20 = arith.constant 0 : index
    %23 = vector.load %arg8[%c0_19, %c0_20] : memref<1x128xf32, #tpu.memory_space<vmem>>, vector<1x128xf32>
    %24 = vector.broadcast %23 : vector<1x128xf32> to vector<16x128xf32>
    %25 = arith.addf %22, %24 : vector<16x128xf32>
    %cst_21 = arith.constant 0.000000e+00 : f32
    %26 = vector.broadcast %cst_21 : f32 to vector<16x128xf32>
    %27 = arith.maximumf %25, %26 : vector<16x128xf32>
    %c0_22 = arith.constant 0 : index
    %c0_23 = arith.constant 0 : index
    %28 = vector.load %arg9[%c0_22, %c0_23] : memref<128x256xf32, #tpu.memory_space<vmem>>, vector<128x256xf32>
    %cst_24 = arith.constant dense<0.000000e+00> : vector<16x256xf32>
    %29 = tpu.matmul %27, %28, %cst_24 {dimension_numbers = #tpu.dot_dimension_numbers<[1], [0], [0], [1], [0, 0, 1, 1], [], []>} : vector<16x128xf32>, vector<128x256xf32>, vector<16x256xf32> -> vector<16x256xf32>
    %c0_25 = arith.constant 0 : index
    %c0_26 = arith.constant 0 : index
    %30 = vector.load %arg10[%c0_25, %c0_26] : memref<1x256xf32, #tpu.memory_space<vmem>>, vector<1x256xf32>
    %31 = vector.broadcast %30 : vector<1x256xf32> to vector<16x256xf32>
    %32 = arith.addf %29, %31 : vector<16x256xf32>
    %33 = vector.extract_strided_slice %32 {offsets = [0, 0], sizes = [16, 128], strides = [1, 1]} : vector<16x256xf32> to vector<16x128xf32>
    %34 = arith.negf %33 : vector<16x128xf32>
    %35 = math.exp %34 : vector<16x128xf32>
    %cst_27 = arith.constant 1.000000e+00 : f32
    %36 = vector.broadcast %cst_27 : f32 to vector<16x128xf32>
    %37 = arith.addf %36, %35 : vector<16x128xf32>
    %38 = arith.divf %36, %37 : vector<16x128xf32>
    %c0_28 = arith.constant 0 : index
    %c0_29 = arith.constant 0 : index
    %39 = vector.load %arg12[%c0_28, %c0_29] : memref<16x128xf32, #tpu.memory_space<vmem>>, vector<16x128xf32>
    tpu.vector_store %arg12[%c0_28, %c0_29], %38 {strides = array<i32>} : memref<16x128xf32, #tpu.memory_space<vmem>>, vector<16x128xf32>,
    %40 = vector.extract_strided_slice %32 {offsets = [0, 128], sizes = [16, 128], strides = [1, 1]} : vector<16x256xf32> to vector<16x128xf32>
    %c0_30 = arith.constant 0 : index
    %c0_31 = arith.constant 0 : index
    %41 = vector.load %arg13[%c0_30, %c0_31] : memref<16x128xf32, #tpu.memory_space<vmem>>, vector<16x128xf32>
    tpu.vector_store %arg13[%c0_30, %c0_31], %40 {strides = array<i32>} : memref<16x128xf32, #tpu.memory_space<vmem>>, vector<16x128xf32>,
    return
  }
  func.func @transform_0(%arg0: i32) -> (i32, i32) {
    %c0_i32 = arith.constant 0 : i32
    %c0_i32_0 = arith.constant 0 : i32
    return %arg0, %c0_i32 : i32, i32
  }
  func.func @transform_1(%arg0: i32) -> (i32, i32) {
    %c0_i32 = arith.constant 0 : i32
    %c0_i32_0 = arith.constant 0 : i32
    return %arg0, %c0_i32 : i32, i32
  }
  func.func @transform_2(%arg0: i32) -> (i32, i32) {
    %c0_i32 = arith.constant 0 : i32
    %c0_i32_0 = arith.constant 0 : i32
    return %arg0, %c0_i32 : i32, i32
  }
  func.func @transform_3(%arg0: i32) -> (i32, i32) {
    %c0_i32 = arith.constant 0 : i32
    %c0_i32_0 = arith.constant 0 : i32
    %c0_i32_1 = arith.constant 0 : i32
    return %c0_i32, %c0_i32_0 : i32, i32
  }
  func.func @transform_4(%arg0: i32) -> (i32, i32) {
    %c0_i32 = arith.constant 0 : i32
    %c0_i32_0 = arith.constant 0 : i32
    %c0_i32_1 = arith.constant 0 : i32
    return %c0_i32, %c0_i32_0 : i32, i32
  }
  func.func @transform_5(%arg0: i32) -> (i32, i32) {
    %c0_i32 = arith.constant 0 : i32
    %c0_i32_0 = arith.constant 0 : i32
    %c0_i32_1 = arith.constant 0 : i32
    return %c0_i32, %c0_i32_0 : i32, i32
  }
  func.func @transform_6(%arg0: i32) -> (i32, i32) {
    %c0_i32 = arith.constant 0 : i32
    %c0_i32_0 = arith.constant 0 : i32
    %c0_i32_1 = arith.constant 0 : i32
    return %c0_i32, %c0_i32_0 : i32, i32
  }
  func.func @transform_7(%arg0: i32) -> (i32, i32) {
    %c0_i32 = arith.constant 0 : i32
    %c0_i32_0 = arith.constant 0 : i32
    %c0_i32_1 = arith.constant 0 : i32
    return %c0_i32, %c0_i32_0 : i32, i32
  }
  func.func @transform_8(%arg0: i32) -> (i32, i32) {
    %c0_i32 = arith.constant 0 : i32
    %c0_i32_0 = arith.constant 0 : i32
    %c0_i32_1 = arith.constant 0 : i32
    return %c0_i32, %c0_i32_0 : i32, i32
  }
  func.func @transform_9(%arg0: i32) -> (i32, i32) {
    %c0_i32 = arith.constant 0 : i32
    %c0_i32_0 = arith.constant 0 : i32
    %c0_i32_1 = arith.constant 0 : i32
    return %c0_i32, %c0_i32_0 : i32, i32
  }
  func.func @transform_10(%arg0: i32) -> (i32, i32) {
    %c0_i32 = arith.constant 0 : i32
    %c0_i32_0 = arith.constant 0 : i32
    return %arg0, %c0_i32 : i32, i32
  }
  func.func @transform_11(%arg0: i32) -> (i32, i32) {
    %c0_i32 = arith.constant 0 : i32
    %c0_i32_0 = arith.constant 0 : i32
    return %arg0, %c0_i32 : i32, i32
  }
  func.func @transform_12(%arg0: i32) -> (i32, i32) {
    %c0_i32 = arith.constant 0 : i32
    %c0_i32_0 = arith.constant 0 : i32
    return %arg0, %c0_i32 : i32, i32
  }
}

</mosaic_0001>

<bundles_post_ra>
// kernel: iwae_forward.2
= control target key start
LH: loop header
LB: loop body
LE: loop exit
PB: predicated region body
PF: predicated region fallthrough
CT: control target
= control target key end

     0   :  { %v444_v0 = vmov 0.0   ;;  %vm445_vm0 = vmmov 0   ;;  %s731_s1 = inlined_call_operand.vmem [shape: f32[128,128], index: 1, kind: input, shape index: {}]   ;;  %s732_s3 = inlined_call_operand.vmem [shape: f32[128,128], index: 3, kind: input, shape index: {}]   ;;  %s733_s0 = inlined_call_operand.vmem [shape: f32[8,128], index: 0, kind: input, shape index: {}]   ;;  %s734_s5 = inlined_call_operand.vmem [shape: f32[128,256], index: 5, kind: input, shape index: {}]   ;;  %s735_s2 = inlined_call_operand.vmem [shape: f32[1,128], index: 2, kind: input, shape index: {}]   ;;  %s736_s4 = inlined_call_operand.vmem [shape: f32[1,128], index: 4, kind: input, shape index: {}]   ;;  %s737_s6 = inlined_call_operand.vmem [shape: f32[1,256], index: 6, kind: input, shape index: {}]   ;;  %s738_s7 = inlined_call_operand.vmem [shape: f32[8,256], index: 7, kind: output, shape index: {}]  }
   0x1   :  { %372 = vmatprep.subr.mxu0 %v444_v0  ;;  %v42_v1 = vld [vmem:[%s731_s1 + $0x78] sm:$0xff]  ;;  %v41_v2 = vld [vmem:[%s731_s1 + $0x70] sm:$0xff]  ;;  %404 = vmatprep.mubr.msk.f32.mxu0 %vm445_vm0, %v444_v0  ;;  %v40_v3 = vld [vmem:[%s731_s1 + $0x68] sm:$0xff] }
   0x2   :  { %373 = vmatpush3.msra.mxu0 %v42_v1  ;;  %407 = vmatprep.subr.mxu1 %v444_v0  ;;  %v39_v4 = vld [vmem:[%s731_s1 + $0x60] sm:$0xff]  ;;  %v136_v5 = vld [vmem:[%s732_s3 + $0x78] sm:$0xff]  ;;  %v135_v7 = vld [vmem:[%s732_s3 + $0x70] sm:$0xff] }
   0x3   :  { %374 = vmatprep.subr.mxu0 %v444_v0  ;;  %439 = vmatprep.mubr.msk.f32.mxu1 %vm445_vm0, %v444_v0  ;;  %v38_v6 = vld [vmem:[%s731_s1 + $0x58] sm:$0xff]  ;;  %v134_v8 = vld [vmem:[%s732_s3 + $0x68] sm:$0xff]  ;;  %v37_v9 = vld [vmem:[%s731_s1 + $0x50] sm:$0xff] }
   0x4   :  { %375 = vmatpush3.msra.mxu0 %v41_v2  ;;  %408 = vmatpush3.msra.mxu1 %v136_v5  ;;  %v133_v10 = vld [vmem:[%s732_s3 + $0x60] sm:$0xff]  ;;  %v36_v11 = vld [vmem:[%s731_s1 + $0x48] sm:$0xff]  ;;  %v132_v12 = vld [vmem:[%s732_s3 + $0x58] sm:$0xff] }
   0x5   :  { %376 = vmatprep.subr.mxu0 %v444_v0  ;;  %409 = vmatprep.subr.mxu1 %v444_v0  ;;  %v35_v13 = vld [vmem:[%s731_s1 + $0x40] sm:$0xff]  ;;  %v131_v14 = vld [vmem:[%s732_s3 + $0x50] sm:$0xff]  ;;  %v34_v15 = vld [vmem:[%s731_s1 + $0x38] sm:$0xff] }
   0x6   :  { %377 = vmatpush3.msra.mxu0 %v40_v3  ;;  %410 = vmatpush3.msra.mxu1 %v135_v7  ;;  %v130_v16 = vld [vmem:[%s732_s3 + $0x48] sm:$0xff]  ;;  %v33_v17 = vld [vmem:[%s731_s1 + $0x30] sm:$0xff]  ;;  %v129_v18 = vld [vmem:[%s732_s3 + $0x40] sm:$0xff] }
   0x7   :  { %378 = vmatprep.subr.mxu0 %v444_v0  ;;  %411 = vmatprep.subr.mxu1 %v444_v0  ;;  %v32_v19 = vld [vmem:[%s731_s1 + $0x28] sm:$0xff]  ;;  %v128_v20 = vld [vmem:[%s732_s3 + $0x38] sm:$0xff]  ;;  %v31_v21 = vld [vmem:[%s731_s1 + $0x20] sm:$0xff] }
   0x8   :  { %379 = vmatpush3.msra.mxu0 %v39_v4  ;;  %412 = vmatpush3.msra.mxu1 %v134_v8  ;;  %v127_v22 = vld [vmem:[%s732_s3 + $0x30] sm:$0xff]  ;;  %v30_v23 = vld [vmem:[%s731_s1 + $0x18] sm:$0xff]  ;;  %v126_v24 = vld [vmem:[%s732_s3 + $0x28] sm:$0xff] }
   0x9   :  { %380 = vmatprep.subr.mxu0 %v444_v0  ;;  %413 = vmatprep.subr.mxu1 %v444_v0  ;;  %v29_v25 = vld [vmem:[%s731_s1 + $0x10] sm:$0xff]  ;;  %v125_v26 = vld [vmem:[%s732_s3 + $0x20] sm:$0xff]  ;;  %v28_v27 = vld [vmem:[%s731_s1 + $0x8] sm:$0xff] }
   0xa   :  { %381 = vmatpush3.msra.mxu0 %v38_v6  ;;  %414 = vmatpush3.msra.mxu1 %v133_v10  ;;  %v124_v28 = vld [vmem:[%s732_s3 + $0x18] sm:$0xff]  ;;  %v27_v29 = vld [vmem:[%s731_s1] sm:$0xff]  ;;  %v123_v31 = vld [vmem:[%s732_s3 + $0x10] sm:$0xff] }
   0xb   :  { %382 = vmatprep.subr.mxu0 %v444_v0  ;;  %415 = vmatprep.subr.mxu1 %v444_v0  ;;  %v26_v30 = vld [vmem:[%s733_s0] sm:$0xff]  ;;  %v122_v32 = vld [vmem:[%s732_s3 + $0x8] sm:$0xff]  ;;  %v246_v34 = vld [vmem:[%s734_s5 + $0xf8] sm:$0xff] }
   0xc   :  { %383 = vmatpush3.msra.mxu0 %v37_v9  ;;  %416 = vmatpush3.msra.mxu1 %v132_v12  ;;  %v121_v33 = vld [vmem:[%s732_s3] sm:$0xff]  ;;  %v245_v35 = vld [vmem:[%s734_s5 + $0xf0] sm:$0xff]  ;;  %v244_v36 = vld [vmem:[%s734_s5 + $0xe8] sm:$0xff]  ;;  %v249_v12 = vlaneseq }
   0xd   :  { %384 = vmatprep.subr.mxu0 %v444_v0  ;;  %417 = vmatprep.subr.mxu1 %v444_v0  ;;  %v243_v37 = vld [vmem:[%s734_s5 + $0xe0] sm:$0xff]  ;;  %v242_v38 = vld [vmem:[%s734_s5 + $0xd8] sm:$0xff]  ;;  %v241_v39 = vld [vmem:[%s734_s5 + $0xd0] sm:$0xff] }
   0xe   :  { %385 = vmatpush3.msra.mxu0 %v36_v11  ;;  %418 = vmatpush3.msra.mxu1 %v131_v14  ;;  %v240_v40 = vld [vmem:[%s734_s5 + $0xc8] sm:$0xff]  ;;  %v239_v41 = vld [vmem:[%s734_s5 + $0xc0] sm:$0xff]  ;;  %v238_v42 = vld [vmem:[%s734_s5 + $0xb8] sm:$0xff] }
   0xf   :  { %386 = vmatprep.subr.mxu0 %v444_v0  ;;  %419 = vmatprep.subr.mxu1 %v444_v0  ;;  %v237_v43 = vld [vmem:[%s734_s5 + $0xb0] sm:$0xff]  ;;  %v236_v44 = vld [vmem:[%s734_s5 + $0xa8] sm:$0xff]  ;;  %v235_v45 = vld [vmem:[%s734_s5 + $0xa0] sm:$0xff] }
  0x10   :  { %387 = vmatpush3.msra.mxu0 %v35_v13  ;;  %420 = vmatpush3.msra.mxu1 %v130_v16  ;;  %v234_v46 = vld [vmem:[%s734_s5 + $0x98] sm:$0xff]  ;;  %v233_v47 = vld [vmem:[%s734_s5 + $0x90] sm:$0xff]  ;;  %v232_v48 = vld [vmem:[%s734_s5 + $0x88] sm:$0xff]  ;;  %v250_v13 = vshrl.u32 %v249_v12, 7 }
  0x11   :  { %388 = vmatprep.subr.mxu0 %v444_v0  ;;  %421 = vmatprep.subr.mxu1 %v444_v0  ;;  %v231_v49 = vld [vmem:[%s734_s5 + $0x80] sm:$0xff]  ;;  %v230_v50 = vld [vmem:[%s734_s5 + $0x78] sm:$0xff]  ;;  %v229_v51 = vld [vmem:[%s734_s5 + $0x70] sm:$0xff] }
  0x12   :  { %389 = vmatpush3.msra.mxu0 %v34_v15  ;;  %422 = vmatpush3.msra.mxu1 %v129_v18  ;;  %v228_v52 = vld [vmem:[%s734_s5 + $0x68] sm:$0xff]  ;;  %v227_v53 = vld [vmem:[%s734_s5 + $0x60] sm:$0xff]  ;;  %v226_v54 = vld [vmem:[%s734_s5 + $0x58] sm:$0xff]  ;;  %v251_v14 = vsub.s32 0, %v250_v13  ;;  %v255_v16 = vsub.s32 1, %v250_v13 }
  0x13   :  { %390 = vmatprep.subr.mxu0 %v444_v0  ;;  %423 = vmatprep.subr.mxu1 %v444_v0  ;;  %v225_v55 = vld [vmem:[%s734_s5 + $0x50] sm:$0xff]  ;;  %v224_v56 = vld [vmem:[%s734_s5 + $0x48] sm:$0xff]  ;;  %v223_v57 = vld [vmem:[%s734_s5 + $0x40] sm:$0xff] }
  0x14   :  { %391 = vmatpush3.msra.mxu0 %v33_v17  ;;  %424 = vmatpush3.msra.mxu1 %v128_v20  ;;  %v222_v58 = vld [vmem:[%s734_s5 + $0x38] sm:$0xff]  ;;  %v221_v59 = vld [vmem:[%s734_s5 + $0x30] sm:$0xff]  ;;  %v220_v60 = vld [vmem:[%s734_s5 + $0x28] sm:$0xff] }
  0x15   :  { %392 = vmatprep.subr.mxu0 %v444_v0  ;;  %425 = vmatprep.subr.mxu1 %v444_v0  ;;  %v336_v61 = vld [vmem:[%s735_s2] ss:$0 sm:$0xff]  ;;  %v218_v3 = vld [vmem:[%s734_s5 + $0x18] sm:$0xff]  ;;  %v217_v4 = vld [vmem:[%s734_s5 + $0x10] sm:$0xff] }
  0x16   :  { %393 = vmatpush3.msra.mxu0 %v32_v19  ;;  %426 = vmatpush3.msra.mxu1 %v127_v22  ;;  %v219_v2 = vld [vmem:[%s734_s5 + $0x20] sm:$0xff]  ;;  %v216_v5 = vld [vmem:[%s734_s5 + $0x8] sm:$0xff] }
  0x17   :  { %394 = vmatprep.subr.mxu0 %v444_v0  ;;  %427 = vmatprep.subr.mxu1 %v444_v0  ;;  %v215_v6 = vld [vmem:[%s734_s5] sm:$0xff] }
  0x18   :  { %395 = vmatpush3.msra.mxu0 %v31_v21  ;;  %428 = vmatpush3.msra.mxu1 %v126_v24  ;;  %v337_v7 = vld [vmem:[%s736_s4] ss:$0 sm:$0xff] }
  0x19   :  { %396 = vmatprep.subr.mxu0 %v444_v0  ;;  %429 = vmatprep.subr.mxu1 %v444_v0  ;;  %v247_v15 = vld [vmem:[%s737_s6] sm:$0x3] }
  0x1a   :  { %397 = vmatpush3.msra.mxu0 %v30_v23  ;;  %430 = vmatpush3.msra.mxu1 %v125_v26  ;;  %v252_v17 = vrot.slane %v247_v15, %v251_v14  ;;  %v256_v18 = vrot.slane %v247_v15, %v255_v16 }
  0x1b   :  { %398 = vmatprep.subr.mxu0 %v444_v0  ;;  %431 = vmatprep.subr.mxu1 %v444_v0 }
  0x1c   :  { %399 = vmatpush3.msra.mxu0 %v29_v25  ;;  %432 = vmatpush3.msra.mxu1 %v124_v28 }
  0x1d   :  { %400 = vmatprep.subr.mxu0 %v444_v0  ;;  %433 = vmatprep.subr.mxu1 %v444_v0 }
  0x1e   :  { %401 = vmatpush3.msra.mxu0 %v28_v27  ;;  %434 = vmatpush3.msra.mxu1 %v123_v31 }
  0x1f   :  { %402 = vmatprep.subr.mxu0 %v444_v0  ;;  %435 = vmatprep.subr.mxu1 %v444_v0 }
  0x20   :  { %403 = vmatpush3.msra.mxu0 %v27_v29  ;;  %436 = vmatpush3.msra.mxu1 %v122_v32 }
  0x21   :  { %405 = vmatmul.mubr.f32.vlgmr.msra.gmra.mxu0 %v26_v30  ;;  %437 = vmatprep.subr.mxu1 %v444_v0 }
  0x22   :  { %323 = vmatprep.mubr.f32.mxu0 %v444_v0  ;;  %438 = vmatpush3.msra.mxu1 %v121_v33 }
  0x23   :  { %259 = vmatprep.subr.mxu0 %v246_v34 }
  0x24   :  { %260 = vmatpush1.msra.mxu0 %v245_v35 }
  0x25   :  { %261 = vmatprep.subr.mxu0 %v244_v36 }
  0x26   :  { %262 = vmatpush1.msra.mxu0 %v243_v37 }
  0x27   :  { %263 = vmatprep.subr.mxu0 %v242_v38 }
  0x28   :  { %264 = vmatpush1.msra.mxu0 %v241_v39 }
  0x29   :  { %265 = vmatprep.subr.mxu0 %v240_v40 }
  0x2a   :  { %266 = vmatpush1.msra.mxu0 %v239_v41 }
  0x2b   :  { %267 = vmatprep.subr.mxu0 %v238_v42 }
  0x2c   :  { %268 = vmatpush1.msra.mxu0 %v237_v43 }
  0x2d   :  { %269 = vmatprep.subr.mxu0 %v236_v44 }
  0x2e   :  { %270 = vmatpush1.msra.mxu0 %v235_v45 }
  0x2f   :  { %271 = vmatprep.subr.mxu0 %v234_v46 }
  0x30   :  { %272 = vmatpush1.msra.mxu0 %v233_v47 }
  0x31   :  { %273 = vmatprep.subr.mxu0 %v232_v48 }
  0x32   :  { %274 = vmatpush1.msra.mxu0 %v231_v49 }
  0x33   :  { %275 = vmatprep.subr.mxu0 %v230_v50 }
  0x34   :  { %276 = vmatpush1.msra.mxu0 %v229_v51 }
  0x35   :  { %277 = vmatprep.subr.mxu0 %v228_v52 }
  0x36   :  { %278 = vmatpush1.msra.mxu0 %v227_v53 }
  0x37   :  { %279 = vmatprep.subr.mxu0 %v226_v54 }
  0x38   :  { %280 = vmatpush1.msra.mxu0 %v225_v55 }
  0x39   :  { %281 = vmatprep.subr.mxu0 %v224_v56 }
  0x3a   :  { %282 = vmatpush1.msra.mxu0 %v223_v57 }
  0x3b   :  { %283 = vmatprep.subr.mxu0 %v222_v58 }
  0x3c   :  { %284 = vmatpush1.msra.mxu0 %v221_v59 }
  0x3d   :  { %285 = vmatprep.subr.mxu0 %v220_v60 }
  0x3e   :  { %286 = vmatpush1.msra.mxu0 %v219_v2 }
  0x3f   :  { %287 = vmatprep.subr.mxu0 %v218_v3 }
  0x40   :  { %288 = vmatpush1.msra.mxu0 %v217_v4 }
  0x41   :  { %289 = vmatprep.subr.mxu0 %v216_v5 }
  0x42   :  { %290 = vmatpush1.msra.mxu0 %v215_v6 }
  0xe1   :  { %v116_v62 = vpop.f32.mrf.mxu0 }
  0xe2   :  { %v117_v63 = vadd.f32 %v336_v61, %v116_v62 }
  0xe3   :  { %v406_v0 = vpop.f32.mrf.mxu0 }
  0xe4   :  { %v120_v1 = vmax.f32 %v117_v63, 0.0 }
  0xe6   :  { %440 = vmatmul.mubr.f32.vlgmr.msra.gmra.mxu1 %v120_v1 }
 0x1a6   :  { %v210_v8 = vpop.f32.mrf.mxu1 }
 0x1a7   :  { %v211_v9 = vadd.f32 %v337_v7, %v210_v8 }
 0x1a8   :  { %v441_v10 = vpop.f32.mrf.mxu1 }
 0x1a9   :  { %v214_v11 = vmax.f32 %v211_v9, 0.0 }
 0x1ab   :  { %324 = vmatmul.mubr.f32.vlgmr.msra.gmra.mxu0 %v214_v11 }
 0x26b   :  { %v325_v19 = vpop.f32.mrf.mxu0 }
 0x26c   :  { %v326_v20 = vadd.f32 %v325_v19, %v252_v17 }
 0x26d   :  { %v327_v21 = vpop.f32.mrf.mxu0 }
 0x26e   :  { %330 = vst [vmem:[%s738_s7] sm:$0xff] %v326_v20  ;;  %v328_v22 = vadd.f32 %v327_v21, %v256_v18 }
 0x270   :  { %331 = vst [vmem:[%s738_s7 + $0x8] sm:$0xff] %v328_v22 }

// kernel: iwae_forward.3
= control target key start
LH: loop header
LB: loop body
LE: loop exit
PB: predicated region body
PF: predicated region fallthrough
CT: control target
= control target key end

     0   :  { %s1033_s4 = inlined_call_operand.vmem [shape: f32[128,128], index: 4, kind: input, shape index: {}]   ;;  %s1034_s3 = inlined_call_operand.vmem [shape: f32[128,128], index: 3, kind: input, shape index: {}]   ;;  %s1035_s0 = inlined_call_operand.vmem [shape: f32[16,256], index: 0, kind: input, shape index: {}]   ;;  %s1036_s2 = inlined_call_operand.vmem [shape: f32[16,128], index: 2, kind: input, shape index: {}]   ;;  %s1037_s1 = inlined_call_operand.vmem [shape: f32[16,128], index: 1, kind: input, shape index: {}]   ;;  %s1038_s6 = inlined_call_operand.vmem [shape: f32[128,128], index: 6, kind: input, shape index: {}]   ;;  %s1039_s10 = inlined_call_operand.vmem [shape: f32[16,128], index: 10, kind: output, shape index: {0}]   ;;  %s1040_s8 = inlined_call_operand.vmem [shape: f32[128,256], index: 8, kind: input, shape index: {}]   ;;  %s1041_s5 = inlined_call_operand.vmem [shape: f32[1,128], index: 5, kind: input, shape index: {}]   ;;  %s1042_s7 = inlined_call_operand.vmem [shape: f32[1,128], index: 7, kind: input, shape index: {}]   ;;  %s1043_s9 = inlined_call_operand.vmem [shape: f32[1,256], index: 9, kind: input, shape index: {}]   ;;  %s1044_s12 = inlined_call_operand.vmem [shape: f32[16,128], index: 12, kind: output, shape index: {2}]   ;;  %s1045_s11 = inlined_call_operand.vmem [shape: f32[16,128], index: 11, kind: output, shape index: {1}]  }
   0x1   :  { %v89_v0 = vld [vmem:[%s1033_s4 + $0x78] sm:$0xff]  ;;  %v88_v2 = vld [vmem:[%s1033_s4 + $0x70] sm:$0xff]  ;;  %v87_v4 = vld [vmem:[%s1033_s4 + $0x68] sm:$0xff] }
   0x2   :  { %v71_v1 = vld [vmem:[%s1034_s3 + $0x78] sm:$0xff]  ;;  %558 = vmatprep.subr.mxu0 %v89_v0  ;;  %v70_v3 = vld [vmem:[%s1034_s3 + $0x70] sm:$0xff]  ;;  %v69_v5 = vld [vmem:[%s1034_s3 + $0x68] sm:$0xff] }
   0x3   :  { %593 = vmatprep.subr.mxu1 %v71_v1  ;;  %559 = vmatpush3.msra.mxu0 %v89_v0  ;;  %v86_v6 = vld [vmem:[%s1033_s4 + $0x60] sm:$0xff]  ;;  %v85_v8 = vld [vmem:[%s1033_s4 + $0x58] sm:$0xff]  ;;  %v84_v10 = vld [vmem:[%s1033_s4 + $0x50] sm:$0xff] }
   0x4   :  { %594 = vmatpush3.msra.mxu1 %v71_v1  ;;  %560 = vmatprep.subr.mxu0 %v88_v2  ;;  %v68_v7 = vld [vmem:[%s1034_s3 + $0x60] sm:$0xff]  ;;  %v67_v9 = vld [vmem:[%s1034_s3 + $0x58] sm:$0xff]  ;;  %v66_v11 = vld [vmem:[%s1034_s3 + $0x50] sm:$0xff] }
   0x5   :  { %595 = vmatprep.subr.mxu1 %v70_v3  ;;  %561 = vmatpush3.msra.mxu0 %v88_v2  ;;  %v83_v12 = vld [vmem:[%s1033_s4 + $0x48] sm:$0xff]  ;;  %v41_v15 = vld [vmem:[%s1035_s0 + $0x18] sm:$0xff]  ;;  %v82_v16 = vld [vmem:[%s1033_s4 + $0x40] sm:$0xff] }
   0x6   :  { %596 = vmatpush3.msra.mxu1 %v70_v3  ;;  %562 = vmatprep.subr.mxu0 %v87_v4  ;;  %v65_v13 = vld [vmem:[%s1034_s3 + $0x48] sm:$0xff]  ;;  %v64_v17 = vld [vmem:[%s1034_s3 + $0x40] sm:$0xff]  ;;  %v43_v19 = vmul.f32 0.5, %v41_v15  ;;  %v81_v20 = vld [vmem:[%s1033_s4 + $0x38] sm:$0xff] }
   0x7   :  { %597 = vmatprep.subr.mxu1 %v69_v5  ;;  %563 = vmatpush3.msra.mxu0 %v87_v4  ;;  %v39_v14 = vld [vmem:[%s1035_s0 + $0x8] sm:$0xff]  ;;  %v63_v21 = vld [vmem:[%s1034_s3 + $0x38] sm:$0xff]  ;;  %v80_v24 = vld [vmem:[%s1033_s4 + $0x30] sm:$0xff] }
   0x8   :  { %598 = vmatpush3.msra.mxu1 %v69_v5  ;;  %564 = vmatprep.subr.mxu0 %v86_v6  ;;  %v42_v18 = vmul.f32 0.5, %v39_v14  ;;  %v46_v23 = vmul.f32 1.442695, %v43_v19  ;;  %v62_v25 = vld [vmem:[%s1034_s3 + $0x30] sm:$0xff]  ;;  %v79_v26 = vld [vmem:[%s1033_s4 + $0x28] sm:$0xff]  ;;  %v78_v28 = vld [vmem:[%s1033_s4 + $0x20] sm:$0xff] }
   0x9   :  { %599 = vmatprep.subr.mxu1 %v68_v7  ;;  %565 = vmatpush3.msra.mxu0 %v86_v6  ;;  %v61_v27 = vld [vmem:[%s1034_s3 + $0x28] sm:$0xff]  ;;  %v60_v29 = vld [vmem:[%s1034_s3 + $0x20] sm:$0xff]  ;;  %v77_v30 = vld [vmem:[%s1033_s4 + $0x18] sm:$0xff] }
   0xa   :  { %600 = vmatpush3.msra.mxu1 %v68_v7  ;;  %566 = vmatprep.subr.mxu0 %v85_v8  ;;  %v44_v22 = vmul.f32 1.442695, %v42_v18  ;;  %v59_v31 = vld [vmem:[%s1034_s3 + $0x18] sm:$0xff]  ;;  %v76_v32 = vld [vmem:[%s1033_s4 + $0x10] sm:$0xff]  ;;  %v75_v34 = vld [vmem:[%s1033_s4 + $0x8] sm:$0xff] }
   0xb   :  { %601 = vmatprep.subr.mxu1 %v67_v9  ;;  %567 = vmatpush3.msra.mxu0 %v85_v8  ;;  %v58_v33 = vld [vmem:[%s1034_s3 + $0x10] sm:$0xff]  ;;  %v57_v35 = vld [vmem:[%s1034_s3 + $0x8] sm:$0xff]  ;;  %v48_v36 = vld [vmem:[%s1036_s2] sm:$0xff] }
   0xc   :  { %602 = vmatpush3.msra.mxu1 %v67_v9  ;;  %568 = vmatprep.subr.mxu0 %v84_v10  ;;  %664 = vpow2.f32 %v44_v22  ;;  %v74_v37 = vld [vmem:[%s1033_s4] sm:$0xff]  ;;  %v49_v39 = vld [vmem:[%s1036_s2 + $0x8] sm:$0xff]  ;;  %v40_v46 = vld [vmem:[%s1035_s0 + $0x10] sm:$0xff] }
   0xd   :  { %603 = vmatprep.subr.mxu1 %v66_v11  ;;  %569 = vmatpush3.msra.mxu0 %v84_v10  ;;  %666 = vpow2.f32 %v46_v23  ;;  %v56_v38 = vld [vmem:[%s1034_s3] sm:$0xff]  ;;  %v73_v45 = vld [vmem:[%s1037_s1 + $0x8] sm:$0xff]  ;;  %v266_v48 = vld [vmem:[%s1038_s6 + $0x78] sm:$0xff] }
   0xe   :  { %604 = vmatpush3.msra.mxu1 %v66_v11  ;;  %570 = vmatprep.subr.mxu0 %v83_v12  ;;  %v72_v41 = vld [vmem:[%s1037_s1] sm:$0xff]  ;;  %v265_v51 = vld [vmem:[%s1038_s6 + $0x70] sm:$0xff]  ;;  %v264_v52 = vld [vmem:[%s1038_s6 + $0x68] sm:$0xff] }
   0xf   :  { %605 = vmatprep.subr.mxu1 %v65_v13  ;;  %571 = vmatpush3.msra.mxu0 %v83_v12  ;;  %v38_v42 = vld [vmem:[%s1035_s0] sm:$0xff]  ;;  %v262_v54 = vld [vmem:[%s1038_s6 + $0x58] sm:$0xff]  ;;  %v261_v55 = vld [vmem:[%s1038_s6 + $0x50] sm:$0xff] }
  0x10   :  { %606 = vmatpush3.msra.mxu1 %v65_v13  ;;  %572 = vmatprep.subr.mxu0 %v82_v16  ;;  %v263_v53 = vld [vmem:[%s1038_s6 + $0x60] sm:$0xff]  ;;  %v260_v56 = vld [vmem:[%s1038_s6 + $0x48] sm:$0xff]  ;;  %v258_v58 = vld [vmem:[%s1038_s6 + $0x38] sm:$0xff] }
  0x11   :  { %607 = vmatprep.subr.mxu1 %v64_v17  ;;  %573 = vmatpush3.msra.mxu0 %v82_v16  ;;  %v259_v57 = vld [vmem:[%s1038_s6 + $0x40] sm:$0xff]  ;;  %v257_v59 = vld [vmem:[%s1038_s6 + $0x30] sm:$0xff]  ;;  %v256_v60 = vld [vmem:[%s1038_s6 + $0x28] sm:$0xff] }
  0x12   :  { %608 = vmatpush3.msra.mxu1 %v64_v17  ;;  %574 = vmatprep.subr.mxu0 %v81_v20  ;;  %v255_v61 = vld [vmem:[%s1038_s6 + $0x20] sm:$0xff]  ;;  %v254_v62 = vld [vmem:[%s1038_s6 + $0x18] sm:$0xff]  ;;  %v253_v63 = vld [vmem:[%s1038_s6 + $0x10] sm:$0xff] }
  0x13   :  { %609 = vmatprep.subr.mxu1 %v63_v21  ;;  %575 = vmatpush3.msra.mxu0 %v81_v20  ;;  %v252_v0 = vld [vmem:[%s1038_s6 + $0x8] sm:$0xff]  ;;  %v251_v1 = vld [vmem:[%s1038_s6] sm:$0xff]  ;;  %v382_v2 = vld [vmem:[%s1040_s8 + $0xf8] sm:$0xff] }
  0x14   :  { %610 = vmatpush3.msra.mxu1 %v63_v21  ;;  %576 = vmatprep.subr.mxu0 %v80_v24  ;;  %v381_v3 = vld [vmem:[%s1040_s8 + $0xf0] sm:$0xff]  ;;  %v380_v4 = vld [vmem:[%s1040_s8 + $0xe8] sm:$0xff]  ;;  %v379_v5 = vld [vmem:[%s1040_s8 + $0xe0] sm:$0xff] }
  0x15   :  { %611 = vmatprep.subr.mxu1 %v62_v25  ;;  %577 = vmatpush3.msra.mxu0 %v80_v24  ;;  %v378_v6 = vld [vmem:[%s1040_s8 + $0xd8] sm:$0xff]  ;;  %v377_v7 = vld [vmem:[%s1040_s8 + $0xd0] sm:$0xff]  ;;  %v376_v8 = vld [vmem:[%s1040_s8 + $0xc8] sm:$0xff] }
  0x16   :  { %612 = vmatpush3.msra.mxu1 %v62_v25  ;;  %578 = vmatprep.subr.mxu0 %v79_v26  ;;  %v375_v9 = vld [vmem:[%s1040_s8 + $0xc0] sm:$0xff]  ;;  %v374_v10 = vld [vmem:[%s1040_s8 + $0xb8] sm:$0xff]  ;;  %v373_v11 = vld [vmem:[%s1040_s8 + $0xb0] sm:$0xff] }
  0x17   :  { %613 = vmatprep.subr.mxu1 %v61_v27  ;;  %579 = vmatpush3.msra.mxu0 %v79_v26  ;;  %v372_v12 = vld [vmem:[%s1040_s8 + $0xa8] sm:$0xff]  ;;  %v371_v13 = vld [vmem:[%s1040_s8 + $0xa0] sm:$0xff]  ;;  %v370_v14 = vld [vmem:[%s1040_s8 + $0x98] sm:$0xff] }
  0x18   :  { %614 = vmatpush3.msra.mxu1 %v61_v27  ;;  %580 = vmatprep.subr.mxu0 %v78_v28  ;;  %v369_v15 = vld [vmem:[%s1040_s8 + $0x90] sm:$0xff]  ;;  %v368_v16 = vld [vmem:[%s1040_s8 + $0x88] sm:$0xff]  ;;  %v367_v17 = vld [vmem:[%s1040_s8 + $0x80] sm:$0xff] }
  0x19   :  { %615 = vmatprep.subr.mxu1 %v60_v29  ;;  %581 = vmatpush3.msra.mxu0 %v78_v28  ;;  %v665_v40 = vpop.eup %664  ;;  %v366_v18 = vld [vmem:[%s1040_s8 + $0x78] sm:$0xff]  ;;  %v365_v19 = vld [vmem:[%s1040_s8 + $0x70] sm:$0xff]  ;;  %v364_v20 = vld [vmem:[%s1040_s8 + $0x68] sm:$0xff] }
  0x1a   :  { %616 = vmatpush3.msra.mxu1 %v60_v29  ;;  %582 = vmatprep.subr.mxu0 %v77_v30  ;;  %v667_v43 = vpop.eup %666  ;;  %v50_v44 = vmul.f32 %v665_v40, %v48_v36  ;;  %v363_v21 = vld [vmem:[%s1040_s8 + $0x60] sm:$0xff]  ;;  %v362_v22 = vld [vmem:[%s1040_s8 + $0x58] sm:$0xff]  ;;  %v361_v23 = vld [vmem:[%s1040_s8 + $0x50] sm:$0xff] }
  0x1b   :  { %617 = vmatprep.subr.mxu1 %v59_v31  ;;  %583 = vmatpush3.msra.mxu0 %v77_v30  ;;  %v51_v47 = vmul.f32 %v667_v43, %v49_v39  ;;  %v360_v24 = vld [vmem:[%s1040_s8 + $0x48] sm:$0xff]  ;;  %v359_v25 = vld [vmem:[%s1040_s8 + $0x40] sm:$0xff]  ;;  %v358_v26 = vld [vmem:[%s1040_s8 + $0x38] sm:$0xff] }
  0x1c   :  { %618 = vmatpush3.msra.mxu1 %v59_v31  ;;  %584 = vmatprep.subr.mxu0 %v76_v32  ;;  %v52_v49 = vadd.f32 %v50_v44, %v38_v42  ;;  %v500_v31 = vld [vmem:[%s1041_s5] ss:$0 sm:$0xff]  ;;  %v356_v39 = vld [vmem:[%s1040_s8 + $0x28] sm:$0xff]  ;;  %v353_v42 = vld [vmem:[%s1040_s8 + $0x10] sm:$0xff] }
  0x1d   :  { %619 = vmatprep.subr.mxu1 %v58_v33  ;;  %585 = vmatpush3.msra.mxu0 %v76_v32  ;;  %v53_v50 = vadd.f32 %v51_v47, %v40_v46  ;;  %v355_v40 = vld [vmem:[%s1040_s8 + $0x20] sm:$0xff]  ;;  %v352_v43 = vld [vmem:[%s1040_s8 + $0x8] sm:$0xff] }
  0x1e   :  { %620 = vmatpush3.msra.mxu1 %v58_v33  ;;  %586 = vmatprep.subr.mxu0 %v75_v34  ;;  %54 = vst [vmem:[%s1039_s10] sm:$0xff] %v52_v49  ;;  %v351_v44 = vld [vmem:[%s1040_s8] sm:$0xff] }
  0x1f   :  { %621 = vmatprep.subr.mxu1 %v57_v35  ;;  %587 = vmatpush3.msra.mxu0 %v75_v34  ;;  %55 = vst [vmem:[%s1039_s10 + $0x8] sm:$0xff] %v53_v50  ;;  %v501_v47 = vld [vmem:[%s1042_s7] ss:$0 sm:$0xff] }
  0x20   :  { %622 = vmatpush3.msra.mxu1 %v57_v35  ;;  %588 = vmatprep.subr.mxu0 %v74_v37 }
  0x21   :  { %623 = vmatprep.subr.mxu1 %v56_v38  ;;  %589 = vmatpush3.msra.mxu0 %v74_v37 }
  0x22   :  { %590 = vmatprep.mubr.f32.mxu0 %v72_v41  ;;  %624 = vmatpush3.msra.mxu1 %v56_v38  ;;  %v357_v38 = vld [vmem:[%s1040_s8 + $0x30] sm:$0xff]  ;;  %v354_v41 = vld [vmem:[%s1040_s8 + $0x18] sm:$0xff] }
  0x23   :  { %591 = vmatmul.mubr.f32.vlgmr.msra.gmra.mxu0 %v73_v45  ;;  %625 = vmatprep.mubr.f32.mxu1 %v52_v49  ;;  %v676_v45 = vmov 0.0  }
  0x24   :  { %628 = vmatprep.subr.mxu0 %v266_v48  ;;  %626 = vmatmul.mubr.f32.vlgmr.msra.gmra.mxu1 %v53_v50 }
  0x25   :  { %629 = vmatpush3.msra.mxu0 %v266_v48  ;;  %395 = vmatprep.subr.mxu1 %v382_v2 }
  0x26   :  { %630 = vmatprep.subr.mxu0 %v265_v51  ;;  %396 = vmatpush1.msra.mxu1 %v381_v3 }
  0x27   :  { %631 = vmatpush3.msra.mxu0 %v265_v51  ;;  %397 = vmatprep.subr.mxu1 %v380_v4 }
  0x28   :  { %632 = vmatprep.subr.mxu0 %v264_v52  ;;  %398 = vmatpush1.msra.mxu1 %v379_v5 }
  0x29   :  { %633 = vmatpush3.msra.mxu0 %v264_v52  ;;  %399 = vmatprep.subr.mxu1 %v378_v6 }
  0x2a   :  { %634 = vmatprep.subr.mxu0 %v263_v53  ;;  %400 = vmatpush1.msra.mxu1 %v377_v7 }
  0x2b   :  { %635 = vmatpush3.msra.mxu0 %v263_v53  ;;  %401 = vmatprep.subr.mxu1 %v376_v8  ;;  %v385_v53 = vlaneseq }
  0x2c   :  { %636 = vmatprep.subr.mxu0 %v262_v54  ;;  %402 = vmatpush1.msra.mxu1 %v375_v9 }
  0x2d   :  { %637 = vmatpush3.msra.mxu0 %v262_v54  ;;  %403 = vmatprep.subr.mxu1 %v374_v10  ;;  %v386_v54 = vshrl.u32 %v385_v53, 7 }
  0x2e   :  { %638 = vmatprep.subr.mxu0 %v261_v55  ;;  %404 = vmatpush1.msra.mxu1 %v373_v11 }
  0x2f   :  { %639 = vmatpush3.msra.mxu0 %v261_v55  ;;  %405 = vmatprep.subr.mxu1 %v372_v12  ;;  %v387_v55 = vsub.s32 0, %v386_v54 }
  0x30   :  { %640 = vmatprep.subr.mxu0 %v260_v56  ;;  %406 = vmatpush1.msra.mxu1 %v371_v13 }
  0x31   :  { %641 = vmatpush3.msra.mxu0 %v260_v56  ;;  %407 = vmatprep.subr.mxu1 %v370_v14  ;;  %v383_v56 = vld [vmem:[%s1043_s9] sm:$0x3] }
  0x32   :  { %642 = vmatprep.subr.mxu0 %v259_v57  ;;  %408 = vmatpush1.msra.mxu1 %v369_v15 }
  0x33   :  { %643 = vmatpush3.msra.mxu0 %v259_v57  ;;  %409 = vmatprep.subr.mxu1 %v368_v16  ;;  %v391_v57 = vsub.s32 1, %v386_v54 }
  0x34   :  { %644 = vmatprep.subr.mxu0 %v258_v58  ;;  %410 = vmatpush1.msra.mxu1 %v367_v17 }
  0x35   :  { %645 = vmatpush3.msra.mxu0 %v258_v58  ;;  %411 = vmatprep.subr.mxu1 %v366_v18  ;;  %v388_v58 = vrot.slane %v383_v56, %v387_v55 }
  0x36   :  { %646 = vmatprep.subr.mxu0 %v257_v59  ;;  %412 = vmatpush1.msra.mxu1 %v365_v19 }
  0x37   :  { %647 = vmatpush3.msra.mxu0 %v257_v59  ;;  %413 = vmatprep.subr.mxu1 %v364_v20  ;;  %v392_v59 = vrot.slane %v383_v56, %v391_v57 }
  0x38   :  { %648 = vmatprep.subr.mxu0 %v256_v60  ;;  %414 = vmatpush1.msra.mxu1 %v363_v21 }
  0x39   :  { %649 = vmatpush3.msra.mxu0 %v256_v60  ;;  %415 = vmatprep.subr.mxu1 %v362_v22 }
  0x3a   :  { %650 = vmatprep.subr.mxu0 %v255_v61  ;;  %416 = vmatpush1.msra.mxu1 %v361_v23 }
  0x3b   :  { %651 = vmatpush3.msra.mxu0 %v255_v61  ;;  %417 = vmatprep.subr.mxu1 %v360_v24 }
  0x3c   :  { %652 = vmatprep.subr.mxu0 %v254_v62  ;;  %418 = vmatpush1.msra.mxu1 %v359_v25 }
  0x3d   :  { %653 = vmatpush3.msra.mxu0 %v254_v62  ;;  %419 = vmatprep.subr.mxu1 %v358_v26 }
  0x3e   :  { %654 = vmatprep.subr.mxu0 %v253_v63  ;;  %420 = vmatpush1.msra.mxu1 %v357_v38 }
  0x3f   :  { %655 = vmatpush3.msra.mxu0 %v253_v63  ;;  %421 = vmatprep.subr.mxu1 %v356_v39 }
  0x40   :  { %656 = vmatprep.subr.mxu0 %v252_v0  ;;  %422 = vmatpush1.msra.mxu1 %v355_v40 }
  0x41   :  { %657 = vmatpush3.msra.mxu0 %v252_v0  ;;  %423 = vmatprep.subr.mxu1 %v354_v41 }
  0x42   :  { %658 = vmatprep.subr.mxu0 %v251_v1  ;;  %424 = vmatpush1.msra.mxu1 %v353_v42 }
  0x43   :  { %659 = vmatpush3.msra.mxu0 %v251_v1  ;;  %425 = vmatprep.subr.mxu1 %v352_v43 }
  0x44   :  { %426 = vmatpush1.msra.mxu1 %v351_v44  ;;  %459 = vmatprep.mubr.f32.mxu1 %v676_v45 }
  0xe3   :  { %v592_v27 = vpop.f32.mrf.mxu0 }
  0xe4   :  { %v627_v28 = vpop.f32.mrf.mxu1 }
  0xe5   :  { %v156_v29 = vpop.f32.mrf.mxu0  ;;  %v237_v30 = vadd.f32 %v627_v28, %v592_v27 }
  0xe6   :  { %v231_v32 = vpop.f32.mrf.mxu1 }
  0xe7   :  { %v232_v33 = vadd.f32 %v231_v32, %v156_v29  ;;  %v248_v34 = vadd.f32 %v500_v31, %v237_v30 }
  0xe9   :  { %v247_v35 = vadd.f32 %v500_v31, %v232_v33  ;;  %v250_v37 = vmax.f32 %v248_v34, 0.0 }
  0xeb   :  { %v249_v36 = vmax.f32 %v247_v35, 0.0 }
  0xed   :  { %660 = vmatprep.mubr.f32.mxu0 %v249_v36 }
  0xee   :  { %661 = vmatmul.mubr.f32.vlgmr.msra.gmra.mxu0 %v250_v37 }
 0x1ae   :  { %v662_v46 = vpop.f32.mrf.mxu0 }
 0x1af   :  { %v346_v50 = vadd.f32 %v662_v46, %v501_v47 }
 0x1b0   :  { %v340_v48 = vpop.f32.mrf.mxu0 }
 0x1b1   :  { %v341_v49 = vadd.f32 %v501_v47, %v340_v48  ;;  %v350_v52 = vmax.f32 %v346_v50, 0.0 }
 0x1b3   :  { %v349_v51 = vmax.f32 %v341_v49, 0.0 }
 0x1b5   :  { %460 = vmatmul.mubr.f32.vlgmr.msra.gmra.mxu1 %v349_v51 }
 0x1b6   :  { %465 = vmatprep.mubr.f32.mxu1 %v676_v45 }
 0x1b9   :  { %466 = vmatmul.mubr.f32.gmra.mxu1 %v350_v52 }
 0x275   :  { %v461_v60 = vpop.f32.mrf.mxu1 }
 0x276   :  { %v462_v61 = vadd.f32 %v461_v60, %v388_v58 }
 0x277   :  { %v463_v62 = vpop.f32.mrf.mxu1 }
 0x278   :  { %v502_v63 = vmul.f32 -1.442695, %v462_v61  ;;  %v464_v0 = vadd.f32 %v463_v62, %v392_v59 }
 0x279   :  { %v467_v1 = vpop.f32.mrf.mxu1 }
 0x27a   :  { %668 = vpow2.f32 %v502_v63  ;;  %486 = vst [vmem:[%s1044_s12] sm:$0xff] %v464_v0  ;;  %v468_v2 = vadd.f32 %v467_v1, %v388_v58 }
 0x27b   :  { %v469_v3 = vpop.f32.mrf.mxu1 }
 0x27c   :  { %v503_v4 = vmul.f32 -1.442695, %v468_v2  ;;  %v470_v5 = vadd.f32 %v469_v3, %v392_v59 }
 0x27e   :  { %670 = vpow2.f32 %v503_v4  ;;  %487 = vst [vmem:[%s1044_s12 + $0x8] sm:$0xff] %v470_v5 }
 0x287   :  { %v669_v6 = vpop.eup %668 }
 0x288   :  { %v478_v7 = vadd.f32 1.0, %v669_v6 }
 0x28a   :  { %672 = vrcp.f32 %v478_v7 }
 0x28b   :  { %v671_v8 = vpop.eup %670 }
 0x28c   :  { %v479_v9 = vadd.f32 1.0, %v671_v8 }
 0x28e   :  { %674 = vrcp.f32 %v479_v9 }
 0x297   :  { %v673_v10 = vpop.eup %672 }
 0x298   :  { %484 = vst [vmem:[%s1045_s11] sm:$0xff] %v673_v10 }
 0x29b   :  { %v675_v11 = vpop.eup %674 }
 0x29c   :  { %485 = vst [vmem:[%s1045_s11 + $0x8] sm:$0xff] %v675_v11 }

</bundles_post_ra>
